<compile_context>
chip_gen: v6e
topology: v6e:2x2x1
jax: 0.10.0
libtpu: 0.0.40
codegen_flags: <defaults>
</compile_context>

<pallas_src>
import jax
import jax.numpy as jnp
from jax import lax
from jax.experimental import pallas as pl
from jax.experimental.pallas import tpu as pltpu


_LANE = 128     # lane width (last dim)
_SUBLANE = 8    # f32 sublane width (second-to-last dim)


def _round_up(x: int, m: int) -> int:
    return ((x + m - 1) // m) * m


# ----------------------------------------------------------------------------
# Init-time (one-off) parameter / input preparation
# ----------------------------------------------------------------------------

def prepare_critic_weight(weight: jax.Array,
                          param_dtype=jnp.bfloat16) -> jax.Array:
    """Pad the PyTorch (A, S) Linear weight to (A_pad, S_pad), multiples of 128.

    Lane-dense on both dims -> unmasked loads/stores in the kernel.  Stored in
    bf16 by default to halve weight DMA bytes (pass jnp.float32 to keep full
    precision).  Call once at init and reuse.
    """
    A, S = weight.shape
    A_pad = _round_up(max(A, _LANE), _LANE)
    S_pad = _round_up(max(S, _LANE), _LANE)
    w = jnp.pad(weight, ((0, A_pad - A), (0, S_pad - S)))
    return w.astype(param_dtype)


def prepare_critic_weight_gather(weight: jax.Array,
                                 param_dtype=jnp.bfloat16) -> jax.Array:
    """W^T padded to (S_pad, A_pad) — rows indexed by state id (one-hot fast path)."""
    A, S = weight.shape
    A_pad = _round_up(max(A, _LANE), _LANE)
    S_pad = _round_up(max(S, _LANE), _LANE)
    wt = jnp.pad(weight.T, ((0, S_pad - S), (0, A_pad - A)))
    return wt.astype(param_dtype)


def one_hot_states(state_ids: jax.Array, num_states: int,
                   dtype=jnp.float32) -> jax.Array:
    """One-hot encoding built directly at the 128-padded width (lane-dense input)."""
    S_pad = _round_up(max(num_states, _LANE), _LANE)
    return jax.nn.one_hot(state_ids, S_pad, dtype=dtype)


# ----------------------------------------------------------------------------
# Dense path: works for ANY input (exact nn.Linear semantics, any x)
# ----------------------------------------------------------------------------

def _critic_matmul_kernel(x_ref, w_ref, o_ref):
    # x_ref: (TB, S_pad)   w_ref: (A_pad, S_pad)   o_ref: (TB, A_pad)
    x = x_ref[...]
    w = w_ref[...]
    if x.dtype != w.dtype:
        # Feed the MXU its native bf16 path; exact for one-hot rows (0/1 values).
        x = x.astype(w.dtype)
    # Contract over S with the weight kept in its native (out, in) layout —
    # no transpose materialized anywhere.
    o_ref[...] = lax.dot_general(
        x, w,
        dimension_numbers=(((1,), (1,)), ((), ())),
        preferred_element_type=jnp.float32,
    ).astype(o_ref.dtype)


def _choose_batch_tile(b_pad: int, block_b: int) -> int:
    """Largest TB (multiple of 8, <= block_b) that divides b_pad, split into
    >=2 grid steps when possible so v7x's second TensorCore gets work."""
    max_tb = min(block_b, b_pad)
    min_steps = 2 if b_pad >= 2 * _SUBLANE else 1
    n = max(min_steps, -(-b_pad // max_tb))          # ceil(b_pad / max_tb)
    while not (b_pad % n == 0 and (b_pad // n) % _SUBLANE == 0):
        n += 1                                       # terminates at n = b_pad // 8
    return b_pad // n


def critic_forward(x: jax.Array,
                   weight_padded: jax.Array,
                   num_actions: int,
                   *,
                   block_b: int = 512) -> jax.Array:
    """x: (B, S) or (B, S_pad); weight_padded: (A_pad, S_pad) from prepare_critic_weight."""
    B, S_x = x.shape
    A_pad, S_pad = weight_padded.shape
    if S_x < S_pad:
        # Zero-padding the contraction dim is exact.  Prefer building inputs at
        # S_pad (see one_hot_states) so this per-call pad never runs.
        x = jnp.pad(x, ((0, 0), (0, S_pad - S_x)))
    elif S_x != S_pad:
        raise ValueError(f"input state dim {S_x} exceeds padded weight dim {S_pad}")

    B_pad = _round_up(B, _SUBLANE)
    TB = _choose_batch_tile(B_pad, block_b)          # TB divides B_pad
    if B_pad != B:
        x = jnp.pad(x, ((0, B_pad - B), (0, 0)))     # at most 7 extra rows

    grid = (B_pad // TB,)

    cost = pl.CostEstimate(
        flops=2 * B_pad * S_pad * A_pad,
        transcendentals=0,
        bytes_accessed=(jnp.dtype(x.dtype).itemsize * B_pad * S_pad
                        + jnp.dtype(weight_padded.dtype).itemsize * A_pad * S_pad
                        + 4 * B_pad * A_pad),
    )

    out = pl.pallas_call(
        _critic_matmul_kernel,
        out_shape=jax.ShapeDtypeStruct((B_pad, A_pad), jnp.float32),
        grid_spec=pl.GridSpec(
            grid=grid,
            in_specs=[
                pl.BlockSpec((TB, S_pad), lambda i: (i, 0)),     # batch tile
                pl.BlockSpec((A_pad, S_pad), lambda i: (0, 0)),  # weight resident
            ],
            out_specs=pl.BlockSpec((TB, A_pad), lambda i: (i, 0)),
        ),
        compiler_params=pltpu.CompilerParams(
            # Batch axis is embarrassingly parallel: shards across the two
            # TensorCores on v7x; harmless on v5e/v6e.
            dimension_semantics=("parallel",),
        ),
        cost_estimate=cost,
    )(x, weight_padded)

    # Strip batch / action padding in plain JAX (cheap slice).
    return out[:B, :num_actions]


# ----------------------------------------------------------------------------
# One-hot fast path: scalar-prefetch row gather of W^T (no MXU work at all)
# ----------------------------------------------------------------------------

def _critic_gather_kernel(ids_ref, w_row_ref, o_ref):
    # ids_ref: (B,) int32 in SMEM   w_row_ref: (1, A_pad)   o_ref: (B, A_pad) resident
    i = pl.program_id(0)
    o_ref[pl.ds(i, 1), :] = w_row_ref[...].astype(o_ref.dtype)


def critic_forward_onehot(state_ids: jax.Array,
                          weight_t_padded: jax.Array,
                          num_actions: int) -> jax.Array:
    """Exact Critic forward when inputs are one-hot: q[b] = W^T[state_ids[b]].

    Reads only B rows of the weight (B*A_pad elements instead of A_pad*S_pad
    plus a matmul).  state_ids: (B,) int; weight_t_padded: (S_pad, A_pad).
    """
    (B,) = state_ids.shape
    S_pad, A_pad = weight_t_padded.shape

    out = pl.pallas_call(
        _critic_gather_kernel,
        out_shape=jax.ShapeDtypeStruct((B, A_pad), jnp.float32),
        grid_spec=pltpu.PrefetchScalarGridSpec(
            num_scalar_prefetch=1,
            grid=(B,),
            in_specs=[
                # Element-indexed row gather: index_map returns the element
                # offset (the prefetched state id) along the S_pad dim.
                pl.BlockSpec((pl.Element(1), A_pad), lambda i, ids: (ids[i], 0)),
            ],
            # Output stays resident in VMEM across the whole grid (constant
            # index_map); each step fills one row, single writeback at the end.
            out_specs=pl.BlockSpec((B, A_pad), lambda i, ids: (0, 0)),
        ),
        compiler_params=pltpu.CompilerParams(
            dimension_semantics=("arbitrary",),
        ),
    )(state_ids.astype(jnp.int32), weight_t_padded)

    return out[:, :num_actions]


# ----------------------------------------------------------------------------

if __name__ == "__main__":
    key = jax.random.PRNGKey(0)
    k_w, k_x, k_x2 = jax.random.split(key, 3)

    batch = 8
    num_states = 32
    num_actions = 16

    # Deterministic parameter init (nn.Linear weight layout: (out, in)).
    bound = 1.0 / (num_states ** 0.5)
    weight = jax.random.uniform(
        k_w, (num_actions, num_states), jnp.float32, minval=-bound, maxval=bound
    )

    # Init-time, one-off weight preparation (padded + bf16).
    w_dense = prepare_critic_weight(weight)                 # (A_pad, S_pad)
    w_gather = prepare_critic_weight_gather(weight)         # (S_pad, A_pad)

    # One-hot states, built directly at the padded width (lane-dense input).
    state_ids = jax.random.randint(k_x, (batch,), 0, num_states)
    x = one_hot_states(state_ids, num_states)               # (B, S_pad) f32

    q_dense = jax.block_until_ready(critic_forward(x, w_dense, num_actions))
    q_gather = jax.block_until_ready(
        critic_forward_onehot(state_ids, w_gather, num_actions))

    # References: exact vs. the bf16-stored weight; loose vs. the f32 weight.
    w_deq = weight.astype(jnp.bfloat16).astype(jnp.float32)
    oh = jax.nn.one_hot(state_ids, num_states, dtype=jnp.float32)
    q_ref_bf16 = oh @ w_deq.T
    q_ref_f32 = oh @ weight.T

    assert q_dense.shape == (batch, num_actions)
    assert q_gather.shape == (batch, num_actions)
    assert jnp.allclose(q_dense, q_ref_bf16, atol=1e-5, rtol=1e-5)
    assert jnp.allclose(q_gather, q_ref_bf16, atol=1e-5, rtol=1e-5)
    assert jnp.allclose(q_dense, q_ref_f32, atol=1e-2, rtol=1e-2)   # bf16 weight rounding only

    # Second dense-path check: ragged batch (20 -> B_pad=24, 3 grid steps of TB=8).
    batch2 = 20
    state_ids2 = jax.random.randint(k_x2, (batch2,), 0, num_states)
    x2 = one_hot_states(state_ids2, num_states)
    q2 = jax.block_until_ready(critic_forward(x2, w_dense, num_actions))
    q2_ref = jax.nn.one_hot(state_ids2, num_states, dtype=jnp.float32) @ w_deq.T
    assert q2.shape == (batch2, num_actions)
    assert jnp.allclose(q2, q2_ref, atol=1e-5, rtol=1e-5)

    print("KERNEL_OK")
</pallas_src>

<mosaic_0001>
module attributes {stable_mosaic.version = 11 : i64} {
  func.func @_critic_matmul_kernel(%arg0: i32, %arg1: memref<8x128xf32, #tpu.memory_space<vmem>>, %arg2: memref<128x128xbf16, #tpu.memory_space<vmem>>, %arg3: memref<8x128xf32, #tpu.memory_space<vmem>>) attributes {dimension_semantics = [#tpu.dimension_semantics<parallel>], iteration_bounds = array<i64: 1>, scalar_prefetch = 0 : i64, scratch_operands = 0 : i64, tpu.core_type = #tpu.core_type<tc>, window_params = [{transform_indices = @transform_0, window_bounds = array<i64: 8, 128>}, {pipeline_mode = #tpu.pipeline_mode<synchronous>, transform_indices = @transform_1, window_bounds = array<i64: 128, 128>}, {transform_indices = @transform_2, window_bounds = array<i64: 8, 128>}]} {
    %c0 = arith.constant 0 : index
    %c0_0 = arith.constant 0 : index
    %0 = vector.load %arg1[%c0, %c0_0] : memref<8x128xf32, #tpu.memory_space<vmem>>, vector<8x128xf32>
    %c0_1 = arith.constant 0 : index
    %c0_2 = arith.constant 0 : index
    %1 = vector.load %arg2[%c0_1, %c0_2] : memref<128x128xbf16, #tpu.memory_space<vmem>>, vector<128x128xbf16>
    %2 = arith.truncf %0 : vector<8x128xf32> to vector<8x128xbf16>
    %cst = arith.constant dense<0.000000e+00> : vector<8x128xf32>
    %3 = tpu.matmul %2, %1, %cst {dimension_numbers = #tpu.dot_dimension_numbers<[1], [1], [0], [0], [0, 0, 1, 0], [], []>} : vector<8x128xbf16>, vector<128x128xbf16>, vector<8x128xf32> -> vector<8x128xf32>
    %c0_3 = arith.constant 0 : index
    %c0_4 = arith.constant 0 : index
    %4 = vector.load %arg3[%c0_3, %c0_4] : memref<8x128xf32, #tpu.memory_space<vmem>>, vector<8x128xf32>
    tpu.vector_store %arg3[%c0_3, %c0_4], %3 {strides = array<i32>} : memref<8x128xf32, #tpu.memory_space<vmem>>, vector<8x128xf32>,
    return
  }
  func.func @transform_0(%arg0: i32) -> (i32, i32) {
    %c0_i32 = arith.constant 0 : i32
    %c0_i32_0 = arith.constant 0 : i32
    return %arg0, %c0_i32 : i32, i32
  }
  func.func @transform_1(%arg0: i32) -> (i32, i32) {
    %c0_i32 = arith.constant 0 : i32
    %c0_i32_0 = arith.constant 0 : i32
    %c0_i32_1 = arith.constant 0 : i32
    return %c0_i32, %c0_i32_0 : i32, i32
  }
  func.func @transform_2(%arg0: i32) -> (i32, i32) {
    %c0_i32 = arith.constant 0 : i32
    %c0_i32_0 = arith.constant 0 : i32
    return %arg0, %c0_i32 : i32, i32
  }
}

</mosaic_0001>

<bundles_post_ra>
// kernel: tpu_custom_call.1
= control target key start
LH: loop header
LB: loop body
LE: loop exit
PB: predicated region body
PF: predicated region fallthrough
CT: control target
= control target key end

     0   :  { %7 = vsyncpa [#allocation3], 0  ;;  %s311_s0 = inlined_call_operand.hbm [shape: f32[8,128], index: 0, kind: input, shape index: {}]   ;;  %s312_s1 = inlined_call_operand.hbm [shape: bf16[128,128], index: 1, kind: input, shape index: {}]   ;;  %s313_s2 = inlined_call_operand.hbm [shape: f32[8,128], index: 2, kind: output, shape index: {}]  }
   0x1   :  { %8 = vsyncpa [#allocation6], 0 }
   0x2   :  { %9 = vsyncpa [#allocation4], 0  ;;  %s280_s9 = smov [#allocation2]   ;;  %s281_s11 = smov [#allocation5]  }
   0x3   :  { %s16_s10 = sshll.u32 %s280_s9, 4  ;;  %s25_s12 = sshll.u32 %s281_s11, 4  ;;  %s17_s10 = int_to_ptr.vmem [resolvable:$true] %s16_s10  ;;  %s26_s12 = int_to_ptr.vmem [resolvable:$true] %s25_s12 }
   0x4   :  { %s222_s13 = scalar_lea.vmem %s17_s10, 128  ;;  %p227_p1 = scmp.lt.s32.totalorder %s17_s10, %s17_s10 }
   0x5   :  { %p223_p0 = scmp.ne.s32.totalorder %s17_s10, %s222_s13  ;;  %p228_p2 = scmp.lt.s32.totalorder %s222_s13, %s222_s13 }
   0x7   :  { %p229_p3 = por %p228_p2, %p227_p1 }
   0x9   :  { %p230_p4 = pnand %p229_p3, %p223_p0 }
   0xb   :  { %233 = shalt.err (!%p230_p4)
}
   0xc   :  { %19 = dma.hbm_to_vmem [thread:$0]  %s311_s0, 128, %s17_s10, [#allocation3]  }
   0xd   :  { %s242_s16 = scalar_lea.vmem %s26_s12, 1024  ;;  %p247_p6 = scmp.lt.s32.totalorder %s26_s12, %s26_s12 }
   0xe   :  { %p243_p5 = scmp.ne.s32.totalorder %s26_s12, %s242_s16  ;;  %p248_p7 = scmp.lt.s32.totalorder %s242_s16, %s242_s16 }
  0x10   :  { %p249_p8 = por %p248_p7, %p247_p6 }
  0x12   :  { %p250_p9 = pnand %p249_p8, %p243_p5 }
  0x14   :  { %253 = shalt.err (!%p250_p9)
}
  0x15   :  { %s282_s17 = smov 64   ;;  %s283_s18 = smov 4  }
  0x16   :  { %31 = dma.hbm_to_vmem [thread:$0]  %s312_s1, 1024, %s26_s12, [#allocation6], %s282_s17, %s282_s17, %s283_s18  }
  0x17   :  { %274 = dma.done.wait [#allocation3], 128  }
  0x18   :  { %275 = vsyncadd [#allocation3], 4294967168 }
  0x19   :  { %276 = dma.done.wait [#allocation6], 1024  }
  0x1a   :  { %277 = vsyncadd [#allocation6], 4294966272  ;;  %v284_v0 = vmov 0.0   ;;  %vm285_vm0 = vmmov 0   ;;  %v206_v1 = vld [vmem:[#allocation5 + $0x38] sm:$0xff]   ;;  %v207_v2 = vld [vmem:[#allocation5 + $0x30] sm:$0xff]  }
  0x1b   :  { %179 = vmatprep.subr.bf16.mxu0 %v284_v0  ;;  %195 = vmatprep.mubr.msk.bf16.mxu0 %vm285_vm0, %v284_v0  ;;  %v208_v3 = vld [vmem:[#allocation5 + $0x28] sm:$0xff]   ;;  %v209_v4 = vld [vmem:[#allocation5 + $0x20] sm:$0xff]   ;;  %v210_v5 = vld [vmem:[#allocation5 + $0x18] sm:$0xff]   ;;  %s286_s0 = smov [#allocation7]  }
  0x1c   :  { %180 = vmatpush3.bf16.xpose.msra.mxu0 %v206_v1  ;;  %v211_v6 = vld [vmem:[#allocation5 + $0x10] sm:$0xff]   ;;  %v212_v7 = vld [vmem:[#allocation5 + $0x8] sm:$0xff]   ;;  %v213_v8 = vld [vmem:[#allocation5] sm:$0xff]   ;;  %s152_s1 = sshll.u32 %s286_s0, 4  ;;  %s153_s1 = int_to_ptr.vmem [resolvable:$true] %s152_s1 }
  0x1d   :  { %181 = vmatprep.subr.bf16.mxu0 %v284_v0  ;;  %v39_v9 = vld [vmem:[#allocation2] sm:$0xff]  ;;  %s254_s21 = scalar_lea.vmem %s153_s1, 128  ;;  %p259_p11 = scmp.lt.s32.totalorder %s153_s1, %s153_s1 }
  0x1e   :  { %v56_v10 = vpack.c.bf16 %v39_v9, %v39_v9  ;;  %p255_p10 = scmp.ne.s32.totalorder %s153_s1, %s254_s21  ;;  %p260_p12 = scmp.lt.s32.totalorder %s254_s21, %s254_s21 }
  0x20   :  { %p261_p13 = por %p260_p12, %p259_p11 }
  0x22   :  { %p262_p0 = pnand %p261_p13, %p255_p10 }
  0x24   :  { %182 = vmatpush3.bf16.xpose.msra.mxu0 %v207_v2 }
  0x25   :  { %183 = vmatprep.subr.bf16.mxu0 %v284_v0 }
  0x2c   :  { %184 = vmatpush3.bf16.xpose.msra.mxu0 %v208_v3 }
  0x2d   :  { %185 = vmatprep.subr.bf16.mxu0 %v284_v0 }
  0x34   :  { %186 = vmatpush3.bf16.xpose.msra.mxu0 %v209_v4 }
  0x35   :  { %187 = vmatprep.subr.bf16.mxu0 %v284_v0 }
  0x3c   :  { %188 = vmatpush3.bf16.xpose.msra.mxu0 %v210_v5 }
  0x3d   :  { %189 = vmatprep.subr.bf16.mxu0 %v284_v0 }
  0x44   :  { %190 = vmatpush3.bf16.xpose.msra.mxu0 %v211_v6 }
  0x45   :  { %191 = vmatprep.subr.bf16.mxu0 %v284_v0 }
  0x4c   :  { %192 = vmatpush3.bf16.xpose.msra.mxu0 %v212_v7 }
  0x4d   :  { %193 = vmatprep.subr.bf16.mxu0 %v284_v0 }
  0x54   :  { %194 = vmatpush3.bf16.xpose.msra.mxu0 %v213_v8 }
  0x5b   :  { %196 = vmatmul.mubr.bf16.vlgmr.msra.gmra.mxu0 %v56_v10 }
 0x11b   :  { %v139_v11 = vpop.f32.mrf.mxu0 }
 0x11c   :  { %145 = vst [vmem:[#allocation7] sm:$0xff] %v139_v11 }
 0x11d   :  { %v197_v12 = vpop.f32.mrf.mxu0 }
 0x11e   :  { %265 = shalt.err (!%p262_p0)
}
 0x11f   :  { %155 = dma.vmem_to_hbm [thread:$0]  %s153_s1, 128, %s313_s2, [#allocation4]   ;;  %v142_v13 = vpop.f32.mrf.mxu0 }
 0x121   :  { %v198_v14 = vpop.f32.mrf.mxu0 }
 0x122   :  { %278 = dma.done.wait [#allocation4], 128  }
 0x123   :  { %279 = vsyncadd [#allocation4], 4294967168 }
 0x124   :  { %159 = vsyncpa [#allocation3], 1 }
 0x125   :  { %160 = vsyncpa [#allocation6], 1 }
 0x126   :  { %161 = vsyncpa [#allocation4], 1 }

</bundles_post_ra>
